<compile_context>
chip_gen: v5e
topology: v5e:2x2
jax: 0.10.0
libtpu: 0.0.40
codegen_flags: <defaults>
</compile_context>

<pallas_src>
import functools

import jax
import jax.numpy as jnp
from jax.experimental import pallas as pl
from jax.experimental.pallas import tpu as pltpu


def _linear_kernel(x_ref, w_ref, b_ref, o_ref):
    # x_ref: (tm, F_in) f32, w_ref: (F_in, F_out) bf16 (VMEM-resident),
    # b_ref: (1, F_out) f32, o_ref: (tm, F_out) f32.
    x = x_ref[...].astype(jnp.bfloat16)          # in-kernel cast (VPU, hidden)
    y = jnp.dot(x, w_ref[...], preferred_element_type=jnp.float32)
    o_ref[...] = (y + b_ref[...]).astype(o_ref.dtype)


def auto_padding_forward(x, w_bf16, b, T_max, *, tm=128):
    """Replicates AutoPadding.forward with m = Linear.

    x      : (t, F_in) f32, t <= T_max
    w_bf16 : (F_in, F_out) bf16  (PyTorch weight transposed, pre-cast once)
    b      : (1, F_out) f32
    returns (t, F_out) f32
    """
    t, f_in = x.shape
    f_out = w_bf16.shape[1]
    assert t <= T_max, "sequence length exceeds T"  # trace-time guard, as in the module

    # Single block if the whole sequence fits one tile (full-dim block is
    # always layout-legal); otherwise 128-row blocks (multiple of 8) with a
    # masked partial last block.  >=2 blocks lets v7x shard across both TCs.
    tm_eff = t if t <= tm else tm
    grid = (pl.cdiv(t, tm_eff),)

    return pl.pallas_call(
        _linear_kernel,
        out_shape=jax.ShapeDtypeStruct((t, f_out), jnp.float32),
        grid_spec=pltpu.PrefetchScalarGridSpec(
            num_scalar_prefetch=0,
            grid=grid,
            in_specs=[
                pl.BlockSpec((tm_eff, f_in), lambda i: (i, 0)),
                pl.BlockSpec((f_in, f_out), lambda i: (0, 0)),   # weight resident
                pl.BlockSpec((1, f_out), lambda i: (0, 0)),
            ],
            out_specs=pl.BlockSpec((tm_eff, f_out), lambda i: (i, 0)),
        ),
        compiler_params=pltpu.CompilerParams(
            dimension_semantics=("parallel",),
        ),
    )(x, w_bf16, b)


if __name__ == "__main__":
    key = jax.random.PRNGKey(0)
    k_x, k_w, k_b = jax.random.split(key, 3)

    T_MAX = 512   # AutoPadding's self.T
    t = 200       # actual sequence length (< T_MAX, exercises the padding path)
    F_IN = 256    # lane-dense (multiple of 128)
    F_OUT = 256   # lane-dense (multiple of 128)

    x = jax.random.normal(k_x, (t, F_IN), dtype=jnp.float32)
    # deterministic "Linear" parameters (synthetic init, not a checkpoint)
    w = jax.random.normal(k_w, (F_OUT, F_IN), dtype=jnp.float32) * 0.05
    b = jax.random.normal(k_b, (F_OUT,), dtype=jnp.float32) * 0.1

    # One-time setup (outside the per-call path): transpose + bf16-cast weight.
    w_bf16 = jnp.transpose(w).astype(jnp.bfloat16)   # (F_IN, F_OUT)
    b2 = b.reshape(1, F_OUT)                         # (1, F_OUT)

    fwd = jax.jit(functools.partial(auto_padding_forward, T_max=T_MAX))
    out = jax.block_until_ready(fwd(x, w_bf16, b2))

    # reference in plain JAX: same bf16-rounded operands, f32 accumulate
    xr = x.astype(jnp.bfloat16).astype(jnp.float32)
    wr = w_bf16.astype(jnp.float32)
    ref = xr @ wr + b2

    assert out.shape == (t, F_OUT)
    assert jnp.allclose(out, ref, atol=1e-3, rtol=1e-3), float(
        jnp.max(jnp.abs(out - ref))
    )

    print("KERNEL_OK")
</pallas_src>

<mosaic_0001>
module attributes {stable_mosaic.version = 11 : i64} {
  func.func @_linear_kernel(%arg0: i32, %arg1: memref<128x256xf32, #tpu.memory_space<vmem>>, %arg2: memref<256x256xbf16, #tpu.memory_space<vmem>>, %arg3: memref<1x256xf32, #tpu.memory_space<vmem>>, %arg4: memref<128x256xf32, #tpu.memory_space<vmem>>) attributes {dimension_semantics = [#tpu.dimension_semantics<parallel>], iteration_bounds = array<i64: 2>, scalar_prefetch = 0 : i64, scratch_operands = 0 : i64, tpu.core_type = #tpu.core_type<tc>, window_params = [{transform_indices = @transform_0, window_bounds = array<i64: 128, 256>}, {pipeline_mode = #tpu.pipeline_mode<synchronous>, transform_indices = @transform_1, window_bounds = array<i64: 256, 256>}, {pipeline_mode = #tpu.pipeline_mode<synchronous>, transform_indices = @transform_2, window_bounds = array<i64: 1, 256>}, {transform_indices = @transform_3, window_bounds = array<i64: 128, 256>}]} {
    %c0 = arith.constant 0 : index
    %c0_0 = arith.constant 0 : index
    %0 = vector.load %arg1[%c0, %c0_0] : memref<128x256xf32, #tpu.memory_space<vmem>>, vector<128x256xf32>
    %1 = arith.truncf %0 : vector<128x256xf32> to vector<128x256xbf16>
    %c0_1 = arith.constant 0 : index
    %c0_2 = arith.constant 0 : index
    %2 = vector.load %arg2[%c0_1, %c0_2] : memref<256x256xbf16, #tpu.memory_space<vmem>>, vector<256x256xbf16>
    %cst = arith.constant dense<0.000000e+00> : vector<128x256xf32>
    %3 = tpu.matmul %1, %2, %cst {dimension_numbers = #tpu.dot_dimension_numbers<[1], [0], [0], [1], [0, 0, 1, 1], [], []>} : vector<128x256xbf16>, vector<256x256xbf16>, vector<128x256xf32> -> vector<128x256xf32>
    %c0_3 = arith.constant 0 : index
    %c0_4 = arith.constant 0 : index
    %4 = vector.load %arg3[%c0_3, %c0_4] : memref<1x256xf32, #tpu.memory_space<vmem>>, vector<1x256xf32>
    %5 = vector.broadcast %4 : vector<1x256xf32> to vector<128x256xf32>
    %6 = arith.addf %3, %5 : vector<128x256xf32>
    %c0_5 = arith.constant 0 : index
    %c0_6 = arith.constant 0 : index
    %7 = vector.load %arg4[%c0_5, %c0_6] : memref<128x256xf32, #tpu.memory_space<vmem>>, vector<128x256xf32>
    tpu.vector_store %arg4[%c0_5, %c0_6], %6 {strides = array<i32>} : memref<128x256xf32, #tpu.memory_space<vmem>>, vector<128x256xf32>,
    return
  }
  func.func @transform_0(%arg0: i32) -> (i32, i32) {
    %c0_i32 = arith.constant 0 : i32
    %c0_i32_0 = arith.constant 0 : i32
    return %arg0, %c0_i32 : i32, i32
  }
  func.func @transform_1(%arg0: i32) -> (i32, i32) {
    %c0_i32 = arith.constant 0 : i32
    %c0_i32_0 = arith.constant 0 : i32
    %c0_i32_1 = arith.constant 0 : i32
    return %c0_i32, %c0_i32_0 : i32, i32
  }
  func.func @transform_2(%arg0: i32) -> (i32, i32) {
    %c0_i32 = arith.constant 0 : i32
    %c0_i32_0 = arith.constant 0 : i32
    %c0_i32_1 = arith.constant 0 : i32
    return %c0_i32, %c0_i32_0 : i32, i32
  }
  func.func @transform_3(%arg0: i32) -> (i32, i32) {
    %c0_i32 = arith.constant 0 : i32
    %c0_i32_0 = arith.constant 0 : i32
    return %arg0, %c0_i32 : i32, i32
  }
}

</mosaic_0001>

<bundles_post_ra>
// kernel: auto_padding_forward.1
= control target key start
LH: loop header
LB: loop body
LE: loop exit
PB: predicated region body
PF: predicated region fallthrough
CT: control target
= control target key end

     0   :  { %8 = vsyncpa [#allocation3], 0  ;;  %s1618_s0 = inlined_call_operand.hbm [shape: f32[200,256], index: 0, kind: input, shape index: {}]   ;;  %s1619_s1 = inlined_call_operand.hbm [shape: bf16[256,256], index: 1, kind: input, shape index: {}]   ;;  %s1620_s2 = inlined_call_operand.hbm [shape: f32[1,256], index: 2, kind: input, shape index: {}]   ;;  %s1621_s3 = inlined_call_operand.hbm [shape: f32[200,256], index: 3, kind: output, shape index: {}]  }
   0x1   :  { %10 = vsyncpa [#allocation3 + $0x1], 0 }
   0x2   :  { %11 = vsyncpa [#allocation6], 0 }
   0x3   :  { %12 = vsyncpa [#allocation4], 0 }
   0x4   :  { %14 = vsyncpa [#allocation4 + $0x1], 0  ;;  %s1308_s12 = smov 0   ;;  %s1310_s13 = smov 0  }
   0x5   :  { %s1312_s14 = smov 0   ;;  %s1314_s15 = smov 0  }
   0x6 LB: > { %s1329_s16 = sadd.s32 4294967295, %s1276_s15   ;;  %s834_s17 = sadd.s32 4294967294, %s1276_s15   ;;  %s1276_s15 = sphi %s1314_s15, %s1638_s15   ;;  %s1272_s14 = sphi %s1312_s14, %s1637_s14   ;;  %s1268_s13 = sphi %s1310_s13, %s1636_s13   ;;  %s1264_s12 = sphi %s1308_s12, %s1635_s12  }
   0x7   : > { %s1333_s18 = sadd.s32 1, %s1276_s15   ;;  %s27_s19 = sadd.s32 1, %s1272_s14 }
   0x8   : > { %s24_s20 = ssub.s32 %s1276_s15, %s1333_s18  ;;  %p34_p0 = scmp.ne.s32.totalorder %s1272_s14, %s1268_s13 }
   0x9   : > { %p25_p1 = scmp.eq.s32.totalorder %s24_s20, 0  ;;  %p35_p2 = scmp.eq.s32.totalorder %s1276_s15, 0 }
   0xa   : > { %p40_p3 = scmp.ne.s32.totalorder %s1268_s13, %s1264_s12  ;;  %p1623_p4 = scmp.eq.s32.totalorder %s1329_s16, 0 }
   0xb   : > { %s1345_s21 = scalar_select %p25_p1, %s1272_s14, %s27_s19  }
   0xc   : > { %p1347_p5 = por %p35_p2, %p34_p0  ;;  %p1353_p6 = por %p1623_p4, %p40_p3 }
   0xd   : > { %p106_p7 = scmp.eq.s32.totalorder %s1329_s16, 1  ;;  %p112_p8 = scmp.eq.s32.totalorder %s834_s17, 1 }
   0xe   : > { %p835_p9 = scmp.ge.s32.totalorder %s1276_s15, 1  ;;  %p119_p10 = scmp.lt.s32.totalorder %s1276_s15, 3 }
   0xf   : > { %p1360_p11 = por %p106_p7, %p34_p0  ;;  %p1364_p12 = por %p112_p8, %p40_p3 }
  0x10   : > { %p1368_p13 = pnand %p835_p9, %p119_p10  ;;  %s130_s29 = sshll.u32 %s1619_s1, 4  ;;  %s131_s29 = int_to_ptr.hbm [resolvable:$true] %s130_s29 }
  0x11   : > { %s1627_s25 = scalar_select %p1364_p12, 1, 0 }
  0x12   : > { %p1040_p1 = pneg %p1368_p13  ;;  %s1278_s30 = smov [#allocation5]  }
  0x13   : > { %s132_s4 = sshll.u32 %s1278_s30, 4  ;;  %s145_s7 = sshll.u32 %s1620_s2, 4  ;;  %s133_s4 = int_to_ptr.vmem [resolvable:$true] %s132_s4  ;;  %s146_s7 = int_to_ptr.hbm [resolvable:$true] %s145_s7 }
  0x14   : > { %p1041_p0 = pnand %p1040_p1, %p1623_p4  ;;  %s1279_s8 = smov 128  }
  0x15   : > { %s1280_s9 = smov 8   ;;  %s1281_s10 = smov [#allocation7]  }
  0x16   : > { %1043 = dma.hbm_to_vmem [thread:$0]  (!%p1041_p0), %s131_s29, 4096, %s133_s4, [#allocation6], %s1279_s8, %s1279_s8, %s1280_s9  }
  0x17   : > { %s147_s11 = sshll.u32 %s1281_s10, 4  ;;  %p1622_p2 = scmp.ge.s32.totalorder %s1276_s15, 2  ;;  %s148_s11 = int_to_ptr.vmem [resolvable:$true] %s147_s11 }
  0x18   : > { %1046 = dma.hbm_to_vmem [thread:$0]  (!%p1041_p0), %s146_s7, 32, %s148_s11, [#allocation6]  }
  0x19   : > { %154 = sbr.rel (%p1622_p2) target bundleno = 66 (0x42), region = 24 }
  0x1e   : > { %157 = sbr.rel (!%p1347_p5) target bundleno = 66 (0x42), region = 28  ;;  %s158_s17 = sand.u32 (%p1347_p5), 1, %s1272_s14  }
  0x1f   : > { %s840_s19 = sshll.u32 (%p1347_p5), %s1276_s15, 4  ;;  %s839_s20 = sshll.u32 (%p1347_p5), %s158_s17, 8 }
  0x20   : > { %s164_s27 = ssub.s32 (%p1347_p5), 25, %s840_s19  ;;  %s1392_s4 = scalar_lea.sflag (%p1347_p5), [#allocation3], %s158_s17 }
  0x21   : > { %p165_p3 = scmp.lt.s32.totalorder (%p1347_p5), %s164_s27, 16  ;;  %s162_s5 = scalar_lea.vmem (%p1347_p5), [#allocation2], %s839_s20 }
  0x23   : > { %s1640_s27 = smov (!%p165_p3, %s164_s27), 16 }
  0x24   : > { %s992_s28 = sshll.u32 %s1640_s27, 4 }
  0x25   : > { %s169_s29 = ssub.s32 256, %s992_s28 }
  0x26   : > { %s170_s30 = sshll.u32 %s169_s29, 4 }
  0x27   : > { %171 = vsyncadd %s1392_s4, %s170_s30  ;;  %p1395_p5 = scmp.ne.s32.totalorder %s992_s28, 0  ;;  %s994_s6 = sshll.u32 %s1276_s15, 8 }
  0x28   : > { %s175_s9 = scalar_lea.hbm %s1618_s0, %s994_s6  ;;  %s1403_s10 = sshll.u32 %s162_s5, 4  ;;  %s180_s10 = int_to_ptr.vmem [resolvable:$true] %s1403_s10 }
  0x29   : > { %s177_s11 = sshll.u32 %s175_s9, 4  ;;  %s847_s17 = sshll.u32 %s1640_s27, 8  ;;  %s1406_s11 = int_to_ptr.hbm [resolvable:$true] %s177_s11 }
  0x2a   : > { %s1156_s19 = sshra.s32 %s1406_s11, 4  ;;  %s1158_s20 = sshrl.u32 %s847_s17, 4  ;;  %s1157_s19 = int_to_ptr.hbm [resolvable:$true] %s1156_s19 }
  0x2b   : > { %s1163_s28 = scalar_lea.hbm %s1157_s19, %s1158_s20  ;;  %s1167_s5 = scalar_lea.hbm %s1618_s0, 400 }
  0x2c   : > { %p1164_p7 = scmp.ne.s32.totalorder %s1157_s19, %s1163_s28  ;;  %p1168_p10 = scmp.lt.s32.totalorder %s1157_s19, %s1618_s0 }
  0x2d   : > { %p1169_p1 = scmp.lt.s32.totalorder %s1167_s5, %s1163_s28 }
  0x2e   : > { %p1165_p8 = pnand %p1164_p7, %p1395_p5 }
  0x2f   : > { %p1170_p0 = por %p1169_p1, %p1168_p10 }
  0x30   : > { %p1166_p9 = pneg %p1165_p8 }
  0x32   : > { %p1171_p3 = pnand %p1170_p0, %p1166_p9 }
  0x34   : > { %1174 = shalt.err (!%p1171_p3)
}
  0x35   : > { %s1175_s8 = sshra.s32 %s180_s10, 4  ;;  %s1282_s29 = smov [#allocation2]   ;;  %s1176_s8 = int_to_ptr.vmem [resolvable:$true] %s1175_s8 }
  0x36   : > { %s1182_s9 = scalar_lea.vmem %s1176_s8, %s1158_s20  ;;  %s1186_s30 = scalar_lea.vmem %s1282_s29, 512 }
  0x37   : > { %p1183_p7 = scmp.ne.s32.totalorder %s1176_s8, %s1182_s9  ;;  %p1188_p4 = scmp.lt.s32.totalorder %s1186_s30, %s1182_s9 }
  0x39   : > { %p1184_p8 = pnand %p1183_p7, %p1395_p5 }
  0x3b   : > { %p1185_p2 = pneg %p1184_p8 }
  0x3d   : > { %p1190_p12 = pnand %p1188_p4, %p1185_p2 }
  0x3f   : > { %1193 = shalt.err (!%p1190_p12)
}
  0x40   : > { %s1283_s19 = smov 256   ;;  %s1284_s28 = smov 16  }
  0x41   : > { %185 = dma.hbm_to_vmem [thread:$0]  (%p1395_p5), %s1406_s11, %s847_s17, %s180_s10, %s1392_s4, %s1283_s19, %s1283_s19, %s1284_s28  }
  0x42 PF: > { %191 = sbr.rel (%p1368_p13) target bundleno = 399 (0x18f), region = 32  ;;  %s1435_s20 = sand.u32 (!%p1368_p13), 1, %s1268_s13  }
  0x43   : > { %s849_s5 = sshll.u32 (!%p1368_p13), %s1435_s20, 8  ;;  %s194_s6 = scalar_lea.sflag (!%p1368_p13), [#allocation3], %s1435_s20 }
  0x44   : > { %s1441_s7 = scalar_lea.vmem (!%p1368_p13), [#allocation2], %s849_s5 }
  0x47   : > { %1251 = dma.done.wait (%p1353_p6), %s194_s6, 4096  }
  0x48   : > { %1253 = vsyncadd (%p1353_p6), %s194_s6, 4294963200  ;;  %p1630_p4 = scmp.eq.s32.totalorder %s1329_s16, 0 }
  0x4a   : > { %1255 = dma.done.wait (%p1630_p4), [#allocation6], 4128   ;;  %p1631_p12 = pmov %p1630_p4 }
  0x4b   : > { %v911_v0 = vld [vmem:[#allocation5 + $0x70] sm:$0xf]  ;;  %v1010_v1 = vld [vmem:[#allocation5 + $0x74] sm:$0xf0]  ;;  %v1009_v5 = vld [vmem:[#allocation5 + $0x74] sm:$0xf] }
  0x4c   : > { %1257 = vsyncadd (%p1631_p12), [#allocation6], 4294963168  ;;  %v975_v2 = vld [vmem:[#allocation5 + $0xf0] sm:$0xf]  ;;  %v912_v3 = vor.u32 %v1010_v1, %v911_v0  ;;  %v1026_v4 = vld [vmem:[#allocation5 + $0xf4] sm:$0xf0] }
  0x4d   : > { %v913_v6 = vld [vmem:[#allocation5 + $0x78] sm:$0xf0]  ;;  %v976_v7 = vor.u32 %v1026_v4, %v975_v2  ;;  %v1025_v9 = vld [vmem:[#allocation5 + $0xf4] sm:$0xf]  ;;  %v903_v11 = vld [vmem:[#allocation5 + $0x60] sm:$0xf] }
  0x4e   : > { %v916_v8 = vor.u32 %v1009_v5, %v913_v6  ;;  %v977_v10 = vld [vmem:[#allocation5 + $0xf8] sm:$0xf0]  ;;  %489 = vmatpush.bf16.msra.mxu0 %v912_v3  ;;  %v1008_v13 = vld [vmem:[#allocation5 + $0x64] sm:$0xf0]  ;;  %v967_v14 = vld [vmem:[#allocation5 + $0xe0] sm:$0xf] }
  0x4f   : > { %v980_v12 = vor.u32 %v1025_v9, %v977_v10  ;;  %v1024_v15 = vld [vmem:[#allocation5 + $0xe4] sm:$0xf0]  ;;  %538 = vmatpush.bf16.msra.mxu1 %v976_v7  ;;  %v904_v16 = vor.u32 %v1008_v13, %v903_v11  ;;  %v1007_v18 = vld [vmem:[#allocation5 + $0x64] sm:$0xf]  ;;  %v905_v19 = vld [vmem:[#allocation5 + $0x68] sm:$0xf0] }
  0x50   : > { %587 = vmatpush.bf16.msra.mxu2 %v916_v8  ;;  %v968_v17 = vor.u32 %v1024_v15, %v967_v14  ;;  %v1023_v20 = vld [vmem:[#allocation5 + $0xe4] sm:$0xf]  ;;  %v908_v21 = vor.u32 %v1007_v18, %v905_v19  ;;  %v969_v22 = vld [vmem:[#allocation5 + $0xe8] sm:$0xf0]  ;;  %v895_v23 = vld [vmem:[#allocation5 + $0x50] sm:$0xf] }
  0x51   : > { %636 = vmatpush.bf16.msra.mxu3 %v980_v12  ;;  %v1006_v24 = vld [vmem:[#allocation5 + $0x54] sm:$0xf0]  ;;  %v972_v25 = vor.u32 %v1023_v20, %v969_v22  ;;  %v959_v26 = vld [vmem:[#allocation5 + $0xd0] sm:$0xf]  ;;  %v1005_v28 = vld [vmem:[#allocation5 + $0x54] sm:$0xf] }
  0x52   : > { %v1022_v27 = vld [vmem:[#allocation5 + $0xd4] sm:$0xf0]  ;;  %490 = vmatpush.bf16.msra.mxu0 %v904_v16  ;;  %v896_v29 = vor.u32 %v1006_v24, %v895_v23  ;;  %v897_v30 = vld [vmem:[#allocation5 + $0x58] sm:$0xf0]  ;;  %v1021_v31 = vld [vmem:[#allocation5 + $0xd4] sm:$0xf] }
  0x53   : > { %v961_v32 = vld [vmem:[#allocation5 + $0xd8] sm:$0xf0]  ;;  %539 = vmatpush.bf16.msra.mxu1 %v968_v17  ;;  %v960_v33 = vor.u32 %v1022_v27, %v959_v26  ;;  %v900_v34 = vor.u32 %v1005_v28, %v897_v30  ;;  %v887_v35 = vld [vmem:[#allocation5 + $0x40] sm:$0xf]  ;;  %v1004_v36 = vld [vmem:[#allocation5 + $0x44] sm:$0xf0] }
  0x54   : > { %588 = vmatpush.bf16.msra.mxu2 %v908_v21  ;;  %v951_v37 = vld [vmem:[#allocation5 + $0xc0] sm:$0xf]  ;;  %v964_v38 = vor.u32 %v1021_v31, %v961_v32  ;;  %v1020_v39 = vld [vmem:[#allocation5 + $0xc4] sm:$0xf0]  ;;  %v1003_v40 = vld [vmem:[#allocation5 + $0x44] sm:$0xf]  ;;  %v888_v44 = vor.u32 %v1004_v36, %v887_v35 }
  0x55   : > { %637 = vmatpush.bf16.msra.mxu3 %v972_v25  ;;  %v889_v41 = vld [vmem:[#allocation5 + $0x48] sm:$0xf0]  ;;  %v1019_v42 = vld [vmem:[#allocation5 + $0xc4] sm:$0xf]  ;;  %v952_v45 = vor.u32 %v1020_v39, %v951_v37  ;;  %v879_v47 = vld [vmem:[#allocation5 + $0x30] sm:$0xf] }
  0x56   : > { %v953_v43 = vld [vmem:[#allocation5 + $0xc8] sm:$0xf0]  ;;  %491 = vmatpush.bf16.msra.mxu0 %v896_v29  ;;  %v892_v46 = vor.u32 %v1003_v40, %v889_v41  ;;  %v1002_v48 = vld [vmem:[#allocation5 + $0x34] sm:$0xf0]  ;;  %v943_v49 = vld [vmem:[#allocation5 + $0xb0] sm:$0xf] }
  0x57   : > { %540 = vmatpush.bf16.msra.mxu1 %v960_v33  ;;  %v956_v50 = vor.u32 %v1019_v42, %v953_v43  ;;  %v1018_v51 = vld [vmem:[#allocation5 + $0xb4] sm:$0xf0]  ;;  %v1001_v52 = vld [vmem:[#allocation5 + $0x34] sm:$0xf]  ;;  %v881_v53 = vld [vmem:[#allocation5 + $0x38] sm:$0xf0]  ;;  %v880_v56 = vor.u32 %v1002_v48, %v879_v47 }
  0x58   : > { %589 = vmatpush.bf16.msra.mxu2 %v900_v34  ;;  %v1017_v54 = vld [vmem:[#allocation5 + $0xb4] sm:$0xf]  ;;  %v945_v55 = vld [vmem:[#allocation5 + $0xb8] sm:$0xf0]  ;;  %v944_v57 = vor.u32 %v1018_v51, %v943_v49  ;;  %v884_v58 = vor.u32 %v1001_v52, %v881_v53  ;;  %v871_v59 = vld [vmem:[#allocation5 + $0x20] sm:$0xf] }
  0x59   : > { %638 = vmatpush.bf16.msra.mxu3 %v964_v38  ;;  %v1000_v60 = vld [vmem:[#allocation5 + $0x24] sm:$0xf0]  ;;  %v935_v61 = vld [vmem:[#allocation5 + $0xa0] sm:$0xf]  ;;  %v948_v62 = vor.u32 %v1017_v54, %v945_v55  ;;  %v999_v0 = vld [vmem:[#allocation5 + $0x24] sm:$0xf] }
  0x5a   : > { %492 = vmatpush.bf16.msra.mxu0 %v888_v44  ;;  %v1016_v63 = vld [vmem:[#allocation5 + $0xa4] sm:$0xf0]  ;;  %v873_v1 = vld [vmem:[#allocation5 + $0x28] sm:$0xf0]  ;;  %v1015_v2 = vld [vmem:[#allocation5 + $0xa4] sm:$0xf]  ;;  %v872_v4 = vor.u32 %v1000_v60, %v871_v59 }
  0x5b   : > { %541 = vmatpush.bf16.msra.mxu1 %v952_v45  ;;  %v937_v3 = vld [vmem:[#allocation5 + $0xa8] sm:$0xf0]  ;;  %v936_v5 = vor.u32 %v1016_v63, %v935_v61  ;;  %v876_v6 = vor.u32 %v999_v0, %v873_v1  ;;  %v863_v7 = vld [vmem:[#allocation5 + $0x10] sm:$0xf]  ;;  %v998_v8 = vld [vmem:[#allocation5 + $0x14] sm:$0xf0] }
  0x5c   : > { %590 = vmatpush.bf16.msra.mxu2 %v892_v46  ;;  %v927_v9 = vld [vmem:[#allocation5 + $0x90] sm:$0xf]  ;;  %v940_v10 = vor.u32 %v1015_v2, %v937_v3  ;;  %v1014_v11 = vld [vmem:[#allocation5 + $0x94] sm:$0xf0]  ;;  %v997_v12 = vld [vmem:[#allocation5 + $0x14] sm:$0xf]  ;;  %v864_v16 = vor.u32 %v998_v8, %v863_v7 }
  0x5d   : > { %639 = vmatpush.bf16.msra.mxu3 %v956_v50  ;;  %v865_v13 = vld [vmem:[#allocation5 + $0x18] sm:$0xf0]  ;;  %v1013_v14 = vld [vmem:[#allocation5 + $0x94] sm:$0xf]  ;;  %v928_v17 = vor.u32 %v1014_v11, %v927_v9  ;;  %v855_v19 = vld [vmem:[#allocation5] sm:$0xf] }
  0x5e   : > { %493 = vmatpush.bf16.msra.mxu0 %v880_v56  ;;  %v929_v15 = vld [vmem:[#allocation5 + $0x98] sm:$0xf0]  ;;  %v868_v18 = vor.u32 %v997_v12, %v865_v13  ;;  %v996_v20 = vld [vmem:[#allocation5 + $0x4] sm:$0xf0]  ;;  %v919_v21 = vld [vmem:[#allocation5 + $0x80] sm:$0xf] }
  0x5f   : > { %542 = vmatpush.bf16.msra.mxu1 %v944_v57  ;;  %v932_v22 = vor.u32 %v1013_v14, %v929_v15  ;;  %v1012_v23 = vld [vmem:[#allocation5 + $0x84] sm:$0xf0]  ;;  %v995_v24 = vld [vmem:[#allocation5 + $0x4] sm:$0xf]  ;;  %v857_v25 = vld [vmem:[#allocation5 + $0x8] sm:$0xf0]  ;;  %v856_v28 = vor.u32 %v996_v20, %v855_v19 }
  0x60   : > { %591 = vmatpush.bf16.msra.mxu2 %v884_v58  ;;  %v1011_v26 = vld [vmem:[#allocation5 + $0x84] sm:$0xf]  ;;  %v921_v27 = vld [vmem:[#allocation5 + $0x88] sm:$0xf0]  ;;  %v245_v30 = vld [vmem:[%s1441_s7 + $0x10] sm:$0xff]  ;;  %v920_v31 = vor.u32 %v1012_v23, %v919_v21  ;;  %v860_v32 = vor.u32 %v995_v24, %v857_v25  ;;  %s1490_s23 = scalar_lea.vmem [#allocation8], %s849_s5 }
  0x61   : > { %640 = vmatpush.bf16.msra.mxu3 %v948_v62  ;;  %v243_v29 = vld [vmem:[%s1441_s7] sm:$0xff]  ;;  %v244_v33 = vld [vmem:[%s1441_s7 + $0x8] sm:$0xff]  ;;  %v246_v34 = vld [vmem:[%s1441_s7 + $0x18] sm:$0xff]  ;;  %v924_v35 = vor.u32 %v1011_v26, %v921_v27  ;;  %s718_s26 = scalar_lea.sflag [#allocation4], %s1435_s20  ;;  %s982_s27 = sshll.u32 (%p1360_p11), %s1329_s16, 4 }
  0x62   : > { %494 = vmatpush.bf16.msra.mxu0 %v872_v4  ;;  %v275_v36 = vpack.c.bf16 %v245_v30, %v243_v29  ;;  %v276_v37 = vpack.c.bf16 %v246_v34, %v244_v33  ;;  %v247_v38 = vld [vmem:[%s1441_s7 + $0x20] sm:$0xff]  ;;  %v249_v39 = vld [vmem:[%s1441_s7 + $0x30] sm:$0xff]  ;;  %v248_v40 = vld [vmem:[%s1441_s7 + $0x28] sm:$0xff]  ;;  %s726_s4 = ssub.s32 (%p1360_p11), 25, %s982_s27 }
  0x63   : > { %543 = vmatpush.bf16.msra.mxu1 %v936_v5  ;;  %v250_v41 = vld [vmem:[%s1441_s7 + $0x38] sm:$0xff]  ;;  %v277_v42 = vpack.c.bf16 %v249_v39, %v247_v38  ;;  %v251_v44 = vld [vmem:[%s1441_s7 + $0x40] sm:$0xff]  ;;  %v253_v45 = vld [vmem:[%s1441_s7 + $0x50] sm:$0xff]  ;;  %p727_p6 = scmp.lt.s32.totalorder (%p1360_p11), %s726_s4, 16 }
  0x64   : > { %592 = vmatpush.bf16.msra.mxu2 %v876_v6  ;;  %v278_v43 = vpack.c.bf16 %v250_v41, %v248_v40  ;;  %v252_v46 = vld [vmem:[%s1441_s7 + $0x48] sm:$0xff]  ;;  %v254_v47 = vld [vmem:[%s1441_s7 + $0x58] sm:$0xff]  ;;  %v279_v48 = vpack.c.bf16 %v253_v45, %v251_v44  ;;  %v255_v50 = vld [vmem:[%s1441_s7 + $0x60] sm:$0xff] }
  0x65   : > { %641 = vmatpush.bf16.msra.mxu3 %v940_v10  ;;  %v280_v49 = vpack.c.bf16 %v254_v47, %v252_v46  ;;  %v257_v51 = vld [vmem:[%s1441_s7 + $0x70] sm:$0xff]  ;;  %v256_v52 = vld [vmem:[%s1441_s7 + $0x68] sm:$0xff]  ;;  %v258_v53 = vld [vmem:[%s1441_s7 + $0x78] sm:$0xff] }
  0x66   : > { %495 = vmatpush.bf16.msra.mxu0 %v864_v16  ;;  %v281_v54 = vpack.c.bf16 %v257_v51, %v255_v50  ;;  %v282_v55 = vpack.c.bf16 %v258_v53, %v256_v52  ;;  %v259_v56 = vld [vmem:[%s1441_s7 + $0x80] sm:$0xff]  ;;  %v261_v57 = vld [vmem:[%s1441_s7 + $0x90] sm:$0xff]  ;;  %v260_v58 = vld [vmem:[%s1441_s7 + $0x88] sm:$0xff] }
  0x67   : > { %544 = vmatpush.bf16.msra.mxu1 %v928_v17  ;;  %v262_v59 = vld [vmem:[%s1441_s7 + $0x98] sm:$0xff]  ;;  %v283_v60 = vpack.c.bf16 %v261_v57, %v259_v56  ;;  %v263_v62 = vld [vmem:[%s1441_s7 + $0xa0] sm:$0xff]  ;;  %v265_v63 = vld [vmem:[%s1441_s7 + $0xb0] sm:$0xff] }
  0x68   : > { %593 = vmatpush.bf16.msra.mxu2 %v868_v18  ;;  %v284_v61 = vpack.c.bf16 %v262_v59, %v260_v58  ;;  %v264_v0 = vld [vmem:[%s1441_s7 + $0xa8] sm:$0xff]  ;;  %v266_v1 = vld [vmem:[%s1441_s7 + $0xb8] sm:$0xff]  ;;  %v285_v2 = vpack.c.bf16 %v265_v63, %v263_v62  ;;  %v267_v4 = vld [vmem:[%s1441_s7 + $0xc0] sm:$0xff] }
  0x69   : > { %642 = vmatpush.bf16.msra.mxu3 %v932_v22  ;;  %v286_v3 = vpack.c.bf16 %v266_v1, %v264_v0  ;;  %v269_v5 = vld [vmem:[%s1441_s7 + $0xd0] sm:$0xff]  ;;  %v268_v6 = vld [vmem:[%s1441_s7 + $0xc8] sm:$0xff]  ;;  %v270_v7 = vld [vmem:[%s1441_s7 + $0xd8] sm:$0xff] }
  0x6a   : > { %496 = vmatpush.bf16.msra.mxu0 %v856_v28  ;;  %v287_v8 = vpack.c.bf16 %v269_v5, %v267_v4  ;;  %v288_v9 = vpack.c.bf16 %v270_v7, %v268_v6  ;;  %v271_v10 = vld [vmem:[%s1441_s7 + $0xe0] sm:$0xff]  ;;  %v273_v11 = vld [vmem:[%s1441_s7 + $0xf0] sm:$0xff]  ;;  %v272_v12 = vld [vmem:[%s1441_s7 + $0xe8] sm:$0xff] }
  0x6b   : > { %545 = vmatpush.bf16.msra.mxu1 %v920_v31  ;;  %v274_v13 = vld [vmem:[%s1441_s7 + $0xf8] sm:$0xff]  ;;  %v289_v14 = vpack.c.bf16 %v273_v11, %v271_v10  ;;  %v323_v16 = vld [vmem:[#allocation7] sm:$0x3] }
  0x6c   : > { %594 = vmatpush.bf16.msra.mxu2 %v860_v32  ;;  %v290_v15 = vpack.c.bf16 %v274_v13, %v272_v12  ;;  %v1483_v17 = vperm.slane %v323_v16, 0  ;;  %v1486_v22 = vperm.slane %v323_v16, 1 }
  0x6d   : > { %643 = vmatpush.bf16.msra.mxu3 %v924_v35  ;;  %497 = vmatmul.bf16.vlgmr.msra.gmra.mxu0 %v275_v36 }
  0x6e   : > { %546 = vmatmul.bf16.vlgmr.msra.gmra.mxu1 %v276_v37 }
  0x6f   : > { %595 = vmatmul.bf16.vlgmr.msra.gmra.mxu2 %v275_v36 }
  0x70   : > { %644 = vmatmul.bf16.vlgmr.msra.gmra.mxu3 %v276_v37 }
  0x7d   : > { %502 = vmatmul.bf16.gmra.mxu0 %v277_v42 }
  0x7e   : > { %551 = vmatmul.bf16.gmra.mxu1 %v278_v43 }
  0x7f   : > { %600 = vmatmul.bf16.gmra.mxu2 %v277_v42 }
  0x80   : > { %649 = vmatmul.bf16.gmra.mxu3 %v278_v43 }
  0x8d   : > { %507 = vmatmul.bf16.gmra.mxu0 %v279_v48 }
  0x8e   : > { %556 = vmatmul.bf16.gmra.mxu1 %v280_v49 }
  0x8f   : > { %605 = vmatmul.bf16.gmra.mxu2 %v279_v48 }
  0x90   : > { %654 = vmatmul.bf16.gmra.mxu3 %v280_v49 }
  0x9d   : > { %512 = vmatmul.bf16.gmra.mxu0 %v281_v54 }
  0x9e   : > { %561 = vmatmul.bf16.gmra.mxu1 %v282_v55 }
  0x9f   : > { %610 = vmatmul.bf16.gmra.mxu2 %v281_v54 }
  0xa0   : > { %659 = vmatmul.bf16.gmra.mxu3 %v282_v55 }
  0xad   : > { %517 = vmatmul.bf16.gmra.mxu0 %v283_v60 }
  0xae   : > { %566 = vmatmul.bf16.gmra.mxu1 %v284_v61 }
  0xaf   : > { %615 = vmatmul.bf16.gmra.mxu2 %v283_v60 }
  0xb0   : > { %664 = vmatmul.bf16.gmra.mxu3 %v284_v61 }
  0xbd   : > { %522 = vmatmul.bf16.gmra.mxu0 %v285_v2 }
  0xbe   : > { %571 = vmatmul.bf16.gmra.mxu1 %v286_v3 }
  0xbf   : > { %620 = vmatmul.bf16.gmra.mxu2 %v285_v2 }
  0xc0   : > { %669 = vmatmul.bf16.gmra.mxu3 %v286_v3 }
  0xcd   : > { %527 = vmatmul.bf16.gmra.mxu0 %v287_v8 }
  0xce   : > { %576 = vmatmul.bf16.gmra.mxu1 %v288_v9 }
  0xcf   : > { %625 = vmatmul.bf16.gmra.mxu2 %v287_v8 }
  0xd0   : > { %674 = vmatmul.bf16.gmra.mxu3 %v288_v9 }
  0xdd   : > { %532 = vmatmul.bf16.gmra.mxu0 %v289_v14 }
  0xde   : > { %581 = vmatmul.bf16.gmra.mxu1 %v290_v15 }
  0xdf   : > { %630 = vmatmul.bf16.gmra.mxu2 %v289_v14 }
  0xe0   : > { %679 = vmatmul.bf16.gmra.mxu3 %v290_v15 }
  0xea   : > { %v498_v18 = vpop.f32.mrf.mxu0 }
  0xeb   : > { %v499_v19 = vadd.f32 %v498_v18, %v1483_v17  ;;  %v547_v20 = vpop.f32.mrf.mxu1 }
  0xed   : > { %v548_v21 = vadd.f32 %v547_v20, %v499_v19 }
  0xef   : > { %685 = vst [vmem:[%s1490_s23] sm:$0xff] %v548_v21 }
  0xf2   : > { %v596_v23 = vpop.f32.mrf.mxu2  ;;  %v500_v26 = vpop.f32.mrf.mxu0 }
  0xf3   : > { %v597_v24 = vadd.f32 %v596_v23, %v1486_v22  ;;  %v645_v25 = vpop.f32.mrf.mxu3  ;;  %v501_v27 = vadd.f32 %v500_v26, %v1483_v17  ;;  %v549_v28 = vpop.f32.mrf.mxu1 }
  0xf5   : > { %v646_v29 = vadd.f32 %v645_v25, %v597_v24  ;;  %v550_v30 = vadd.f32 %v549_v28, %v501_v27 }
  0xf7   : > { %686 = vst [vmem:[%s1490_s23 + $0x8] sm:$0xff] %v646_v29 }
  0xf8   : > { %687 = vst [vmem:[%s1490_s23 + $0x10] sm:$0xff] %v550_v30 }
  0xfa   : > { %v598_v31 = vpop.f32.mrf.mxu2  ;;  %v503_v34 = vpop.f32.mrf.mxu0 }
  0xfb   : > { %v599_v32 = vadd.f32 %v598_v31, %v1486_v22  ;;  %v647_v33 = vpop.f32.mrf.mxu3  ;;  %v504_v35 = vadd.f32 %v503_v34, %v1483_v17  ;;  %v552_v36 = vpop.f32.mrf.mxu1 }
  0xfd   : > { %v648_v37 = vadd.f32 %v647_v33, %v599_v32  ;;  %v553_v38 = vadd.f32 %v552_v36, %v504_v35 }
  0xff   : > { %688 = vst [vmem:[%s1490_s23 + $0x18] sm:$0xff] %v648_v37 }
 0x100   : > { %689 = vst [vmem:[%s1490_s23 + $0x20] sm:$0xff] %v553_v38 }
 0x102   : > { %v601_v39 = vpop.f32.mrf.mxu2  ;;  %v505_v42 = vpop.f32.mrf.mxu0 }
 0x103   : > { %v602_v40 = vadd.f32 %v601_v39, %v1486_v22  ;;  %v650_v41 = vpop.f32.mrf.mxu3  ;;  %v506_v43 = vadd.f32 %v505_v42, %v1483_v17  ;;  %v554_v44 = vpop.f32.mrf.mxu1 }
 0x105   : > { %v651_v45 = vadd.f32 %v650_v41, %v602_v40  ;;  %v555_v46 = vadd.f32 %v554_v44, %v506_v43 }
 0x107   : > { %690 = vst [vmem:[%s1490_s23 + $0x28] sm:$0xff] %v651_v45 }
 0x108   : > { %691 = vst [vmem:[%s1490_s23 + $0x30] sm:$0xff] %v555_v46 }
 0x10a   : > { %v603_v47 = vpop.f32.mrf.mxu2  ;;  %v508_v50 = vpop.f32.mrf.mxu0 }
 0x10b   : > { %v604_v48 = vadd.f32 %v603_v47, %v1486_v22  ;;  %v652_v49 = vpop.f32.mrf.mxu3  ;;  %v509_v51 = vadd.f32 %v508_v50, %v1483_v17  ;;  %v557_v52 = vpop.f32.mrf.mxu1 }
 0x10d   : > { %v653_v53 = vadd.f32 %v652_v49, %v604_v48  ;;  %v558_v54 = vadd.f32 %v557_v52, %v509_v51 }
 0x10f   : > { %692 = vst [vmem:[%s1490_s23 + $0x38] sm:$0xff] %v653_v53 }
 0x110   : > { %693 = vst [vmem:[%s1490_s23 + $0x40] sm:$0xff] %v558_v54 }
 0x112   : > { %v606_v55 = vpop.f32.mrf.mxu2  ;;  %v510_v58 = vpop.f32.mrf.mxu0 }
 0x113   : > { %v607_v56 = vadd.f32 %v606_v55, %v1486_v22  ;;  %v655_v57 = vpop.f32.mrf.mxu3  ;;  %v511_v59 = vadd.f32 %v510_v58, %v1483_v17  ;;  %v559_v60 = vpop.f32.mrf.mxu1 }
 0x115   : > { %v656_v61 = vadd.f32 %v655_v57, %v607_v56  ;;  %v560_v62 = vadd.f32 %v559_v60, %v511_v59 }
 0x117   : > { %694 = vst [vmem:[%s1490_s23 + $0x48] sm:$0xff] %v656_v61 }
 0x118   : > { %695 = vst [vmem:[%s1490_s23 + $0x50] sm:$0xff] %v560_v62 }
 0x11a   : > { %v608_v63 = vpop.f32.mrf.mxu2  ;;  %v513_v2 = vpop.f32.mrf.mxu0 }
 0x11b   : > { %v609_v0 = vadd.f32 %v608_v63, %v1486_v22  ;;  %v657_v1 = vpop.f32.mrf.mxu3  ;;  %v514_v3 = vadd.f32 %v513_v2, %v1483_v17  ;;  %v562_v4 = vpop.f32.mrf.mxu1 }
 0x11d   : > { %v658_v5 = vadd.f32 %v657_v1, %v609_v0  ;;  %v563_v6 = vadd.f32 %v562_v4, %v514_v3 }
 0x11f   : > { %696 = vst [vmem:[%s1490_s23 + $0x58] sm:$0xff] %v658_v5 }
 0x120   : > { %697 = vst [vmem:[%s1490_s23 + $0x60] sm:$0xff] %v563_v6 }
 0x122   : > { %v611_v7 = vpop.f32.mrf.mxu2  ;;  %v515_v10 = vpop.f32.mrf.mxu0 }
 0x123   : > { %v612_v8 = vadd.f32 %v611_v7, %v1486_v22  ;;  %v660_v9 = vpop.f32.mrf.mxu3  ;;  %v516_v11 = vadd.f32 %v515_v10, %v1483_v17  ;;  %v564_v12 = vpop.f32.mrf.mxu1 }
 0x125   : > { %v661_v13 = vadd.f32 %v660_v9, %v612_v8  ;;  %v565_v14 = vadd.f32 %v564_v12, %v516_v11 }
 0x127   : > { %698 = vst [vmem:[%s1490_s23 + $0x68] sm:$0xff] %v661_v13 }
 0x128   : > { %699 = vst [vmem:[%s1490_s23 + $0x70] sm:$0xff] %v565_v14 }
 0x12a   : > { %v613_v15 = vpop.f32.mrf.mxu2  ;;  %v518_v19 = vpop.f32.mrf.mxu0 }
 0x12b   : > { %v614_v16 = vadd.f32 %v613_v15, %v1486_v22  ;;  %v662_v18 = vpop.f32.mrf.mxu3  ;;  %v519_v20 = vadd.f32 %v518_v19, %v1483_v17  ;;  %v567_v21 = vpop.f32.mrf.mxu1 }
 0x12d   : > { %v663_v23 = vadd.f32 %v662_v18, %v614_v16  ;;  %v568_v24 = vadd.f32 %v567_v21, %v519_v20 }
 0x12f   : > { %700 = vst [vmem:[%s1490_s23 + $0x78] sm:$0xff] %v663_v23 }
 0x130   : > { %701 = vst [vmem:[%s1490_s23 + $0x80] sm:$0xff] %v568_v24 }
 0x132   : > { %v616_v25 = vpop.f32.mrf.mxu2  ;;  %v520_v28 = vpop.f32.mrf.mxu0 }
 0x133   : > { %v617_v26 = vadd.f32 %v616_v25, %v1486_v22  ;;  %v665_v27 = vpop.f32.mrf.mxu3  ;;  %v521_v29 = vadd.f32 %v520_v28, %v1483_v17  ;;  %v569_v30 = vpop.f32.mrf.mxu1 }
 0x135   : > { %v666_v31 = vadd.f32 %v665_v27, %v617_v26  ;;  %v570_v32 = vadd.f32 %v569_v30, %v521_v29 }
 0x137   : > { %702 = vst [vmem:[%s1490_s23 + $0x88] sm:$0xff] %v666_v31 }
 0x138   : > { %703 = vst [vmem:[%s1490_s23 + $0x90] sm:$0xff] %v570_v32 }
 0x13a   : > { %v618_v33 = vpop.f32.mrf.mxu2  ;;  %v523_v36 = vpop.f32.mrf.mxu0 }
 0x13b   : > { %v619_v34 = vadd.f32 %v618_v33, %v1486_v22  ;;  %v667_v35 = vpop.f32.mrf.mxu3  ;;  %v524_v37 = vadd.f32 %v523_v36, %v1483_v17  ;;  %v572_v38 = vpop.f32.mrf.mxu1 }
 0x13d   : > { %v668_v39 = vadd.f32 %v667_v35, %v619_v34  ;;  %v573_v40 = vadd.f32 %v572_v38, %v524_v37 }
 0x13f   : > { %704 = vst [vmem:[%s1490_s23 + $0x98] sm:$0xff] %v668_v39 }
 0x140   : > { %705 = vst [vmem:[%s1490_s23 + $0xa0] sm:$0xff] %v573_v40 }
 0x142   : > { %v621_v41 = vpop.f32.mrf.mxu2  ;;  %v525_v44 = vpop.f32.mrf.mxu0 }
 0x143   : > { %v622_v42 = vadd.f32 %v621_v41, %v1486_v22  ;;  %v670_v43 = vpop.f32.mrf.mxu3  ;;  %v526_v45 = vadd.f32 %v525_v44, %v1483_v17  ;;  %v574_v46 = vpop.f32.mrf.mxu1 }
 0x145   : > { %v671_v47 = vadd.f32 %v670_v43, %v622_v42  ;;  %v575_v48 = vadd.f32 %v574_v46, %v526_v45 }
 0x147   : > { %706 = vst [vmem:[%s1490_s23 + $0xa8] sm:$0xff] %v671_v47 }
 0x148   : > { %707 = vst [vmem:[%s1490_s23 + $0xb0] sm:$0xff] %v575_v48 }
 0x14a   : > { %v623_v49 = vpop.f32.mrf.mxu2  ;;  %v528_v52 = vpop.f32.mrf.mxu0 }
 0x14b   : > { %v624_v50 = vadd.f32 %v623_v49, %v1486_v22  ;;  %v672_v51 = vpop.f32.mrf.mxu3  ;;  %v529_v53 = vadd.f32 %v528_v52, %v1483_v17  ;;  %v577_v54 = vpop.f32.mrf.mxu1 }
 0x14d   : > { %v673_v55 = vadd.f32 %v672_v51, %v624_v50  ;;  %v578_v56 = vadd.f32 %v577_v54, %v529_v53 }
 0x14f   : > { %708 = vst [vmem:[%s1490_s23 + $0xb8] sm:$0xff] %v673_v55 }
 0x150   : > { %709 = vst [vmem:[%s1490_s23 + $0xc0] sm:$0xff] %v578_v56 }
 0x152   : > { %v626_v57 = vpop.f32.mrf.mxu2  ;;  %v530_v60 = vpop.f32.mrf.mxu0 }
 0x153   : > { %v627_v58 = vadd.f32 %v626_v57, %v1486_v22  ;;  %v675_v59 = vpop.f32.mrf.mxu3  ;;  %v531_v61 = vadd.f32 %v530_v60, %v1483_v17  ;;  %v579_v62 = vpop.f32.mrf.mxu1 }
 0x155   : > { %v676_v63 = vadd.f32 %v675_v59, %v627_v58  ;;  %v580_v0 = vadd.f32 %v579_v62, %v531_v61 }
 0x157   : > { %710 = vst [vmem:[%s1490_s23 + $0xc8] sm:$0xff] %v676_v63 }
 0x158   : > { %711 = vst [vmem:[%s1490_s23 + $0xd0] sm:$0xff] %v580_v0 }
 0x15a   : > { %v628_v1 = vpop.f32.mrf.mxu2  ;;  %v533_v4 = vpop.f32.mrf.mxu0 }
 0x15b   : > { %v629_v2 = vadd.f32 %v628_v1, %v1486_v22  ;;  %v677_v3 = vpop.f32.mrf.mxu3  ;;  %v534_v5 = vadd.f32 %v533_v4, %v1483_v17  ;;  %v582_v6 = vpop.f32.mrf.mxu1 }
 0x15d   : > { %v678_v7 = vadd.f32 %v677_v3, %v629_v2  ;;  %v583_v8 = vadd.f32 %v582_v6, %v534_v5 }
 0x15f   : > { %712 = vst [vmem:[%s1490_s23 + $0xd8] sm:$0xff] %v678_v7 }
 0x160   : > { %713 = vst [vmem:[%s1490_s23 + $0xe0] sm:$0xff] %v583_v8 }
 0x162   : > { %v631_v9 = vpop.f32.mrf.mxu2  ;;  %v535_v12 = vpop.f32.mrf.mxu0 }
 0x163   : > { %v632_v10 = vadd.f32 %v631_v9, %v1486_v22  ;;  %v680_v11 = vpop.f32.mrf.mxu3  ;;  %v536_v13 = vadd.f32 %v535_v12, %v1483_v17  ;;  %v584_v15 = vpop.f32.mrf.mxu1 }
 0x165   : > { %v681_v14 = vadd.f32 %v680_v11, %v632_v10  ;;  %v585_v16 = vadd.f32 %v584_v15, %v536_v13 }
 0x167   : > { %714 = vst [vmem:[%s1490_s23 + $0xe8] sm:$0xff] %v681_v14 }
 0x168   : > { %715 = vst [vmem:[%s1490_s23 + $0xf0] sm:$0xff] %v585_v16 }
 0x16a   : > { %v633_v18 = vpop.f32.mrf.mxu2 }
 0x16b   : > { %v634_v19 = vadd.f32 %v633_v18, %v1486_v22  ;;  %v682_v20 = vpop.f32.mrf.mxu3  ;;  %724 = sbr.rel (!%p1360_p11) target bundleno = 399 (0x18f), region = 48 }
 0x16d   : > { %v683_v21 = vadd.f32 %v682_v20, %v634_v19 }
 0x16f   : > { %716 = vst [vmem:[%s1490_s23 + $0xf8] sm:$0xff] %v683_v21 }
 0x170   : > { %s1642_s4 = smov (!%p727_p6, %s726_s4), 16 }
 0x171   : > { %s1027_s22 = sshll.u32 %s1642_s4, 4 }
 0x172   : > { %s731_s10 = ssub.s32 256, %s1027_s22 }
 0x173   : > { %s732_s11 = sshll.u32 %s731_s10, 4 }
 0x174   : > { %733 = vsyncadd %s718_s26, %s732_s11  ;;  %p1564_p13 = scmp.ne.s32.totalorder %s1027_s22, 0  ;;  %s1029_s17 = sshll.u32 %s1329_s16, 8 }
 0x175   : > { %s737_s29 = scalar_lea.hbm %s1621_s3, %s1029_s17  ;;  %s739_s30 = sshll.u32 %s1490_s23, 4  ;;  %s1573_s30 = int_to_ptr.vmem [resolvable:$true] %s739_s30 }
 0x176   : > { %s741_s19 = sshll.u32 %s737_s29, 4  ;;  %s989_s28 = sshll.u32 %s1642_s4, 8  ;;  %s1575_s19 = int_to_ptr.hbm [resolvable:$true] %s741_s19 }
 0x177   : > { %s1195_s5 = sshra.s32 %s1573_s30, 4  ;;  %s1197_s6 = sshrl.u32 %s989_s28, 4  ;;  %s1196_s5 = int_to_ptr.vmem [resolvable:$true] %s1195_s5 }
 0x178   : > { %s1202_s7 = scalar_lea.vmem %s1196_s5, %s1197_s6  ;;  %s1285_s16 = smov [#allocation8]  }
 0x179   : > { %p1203_p11 = scmp.ne.s32.totalorder %s1196_s5, %s1202_s7  ;;  %s1206_s27 = scalar_lea.vmem %s1285_s16, 512 }
 0x17a   : > { %p1208_p9 = scmp.lt.s32.totalorder %s1206_s27, %s1202_s7 }
 0x17b   : > { %p1204_p2 = pnand %p1203_p11, %p1564_p13 }
 0x17d   : > { %p1205_p5 = pneg %p1204_p2 }
 0x17f   : > { %p1210_p10 = pnand %p1208_p9, %p1205_p5 }
 0x181   : > { %1213 = shalt.err (!%p1210_p10)
}
 0x182   : > { %s1214_s23 = sshra.s32 %s1575_s19, 4  ;;  %s1225_s17 = scalar_lea.hbm %s1621_s3, 400  ;;  %s1215_s23 = int_to_ptr.hbm [resolvable:$true] %s1214_s23 }
 0x183   : > { %s1221_s22 = scalar_lea.hbm %s1215_s23, %s1197_s6  ;;  %p1226_p7 = scmp.lt.s32.totalorder %s1215_s23, %s1621_s3 }
 0x184   : > { %p1222_p1 = scmp.ne.s32.totalorder %s1215_s23, %s1221_s22  ;;  %p1227_p8 = scmp.lt.s32.totalorder %s1225_s17, %s1221_s22 }
 0x186   : > { %p1223_p0 = pnand %p1222_p1, %p1564_p13  ;;  %p1228_p4 = por %p1227_p8, %p1226_p7 }
 0x188   : > { %p1224_p3 = pneg %p1223_p0 }
 0x18a   : > { %p1229_p12 = pnand %p1228_p4, %p1224_p3 }
 0x18c   : > { %1232 = shalt.err (!%p1229_p12)
}
 0x18d   : > { %s1286_s29 = smov 256   ;;  %s1287_s5 = smov 16  }
 0x18e   : > { %747 = dma.vmem_to_hbm [thread:$0]  (%p1564_p13), %s1573_s30, %s989_s28, %s1575_s19, %s718_s26, %s1286_s29, %s1286_s29, %s1287_s5  }
 0x18f PF: > { %s756_s6 = sand.u32 1, %s1264_s12   ;;  %p1633_p6 = scmp.ne.s32.totalorder %s1627_s25, 0 }
 0x190   : > { %p1634_p11 = scmp.ge.s32.totalorder %s1276_s15, 2  ;;  %s757_s7 = scalar_lea.sflag [#allocation4], %s756_s6 }
 0x192   : > { %p1048_p2 = pnand %p1634_p11, %p1633_p6 }
 0x194   : > { %p1049_p5 = pneg %p1048_p2 }
 0x196   : > { %1259 = dma.done.wait (%p1049_p5), %s757_s7, 4096  }
 0x197   : > { %1261 = vsyncadd (%p1049_p5), %s757_s7, 4294963200  ;;  %p17_p9 = scmp.ge.s32.totalorder %s1333_s18, 4   ;;  %s1635_s12 = smov %s1268_s13 }
 0x198   : > { %s1636_s13 = smov %s1272_s14  ;;  %s1637_s14 = smov %s1345_s21 }
 0x199   : > { %s1638_s15 = smov %s1333_s18  ;;  %19 = sbr.rel (!%p17_p9) target bundleno = 6 (0x6), region = 85 }
 0x19e   :  { %763 = vsyncpa [#allocation3], 1 }
 0x19f   :  { %765 = vsyncpa [#allocation3 + $0x1], 1 }
 0x1a0   :  { %766 = vsyncpa [#allocation6], 1 }
 0x1a1   :  { %767 = vsyncpa [#allocation4], 1 }
 0x1a2   :  { %769 = vsyncpa [#allocation4 + $0x1], 1 }

</bundles_post_ra>
